<compile_context>
chip_gen: v7x
topology: tpu7x:2x2x1
jax: 0.10.0
libtpu: 0.0.40
codegen_flags: <defaults>
</compile_context>

<pallas_src>
import functools

import jax
import jax.numpy as jnp
from jax import lax
from jax.experimental import pallas as pl
from jax.experimental.pallas import tpu as pltpu


def _ntxent_kernel(q_ref, p_ref, kt_ref, o_ref, *, tm, m, inv_t):
    q = q_ref[...]                                          # (TM, Dp) bf16

    # (TM, 2N) similarities: canonical MXU form, bf16 operands, f32 accumulate.
    raw = jnp.dot(q, kt_ref[...], preferred_element_type=jnp.float32)

    # Scale by 1/T and apply the constant logsumexp shift in one pass:
    # rows are unit norm, so raw <= ~1  =>  sim - 1/T == (raw - 1) * (1/T).
    shifted = (raw - 1.0) * inv_t

    # Exclude self-similarity (diagonal of the full 2N x 2N matrix).
    q0 = pl.program_id(0) * tm
    col = lax.broadcasted_iota(jnp.int32, (tm, m), 1)
    row = lax.broadcasted_iota(jnp.int32, (tm, m), 0) + q0
    shifted = jnp.where(col == row, jnp.float32(-1e30), shifted)

    # Stable logsumexp with the constant shift added back.
    sum_exp = jnp.sum(jnp.exp(shifted), axis=1)             # (TM,)
    lse = jnp.log(sum_exp) + inv_t                          # (TM,)

    # Positive logit from the same bf16-rounded values that feed the MXU.
    pos = inv_t * jnp.sum(
        q.astype(jnp.float32) * p_ref[...].astype(jnp.float32), axis=1)

    o_ref[0, 0, :] = lse - pos                              # lane-dense store


def ntxent_loss(z1, z2, temperature=0.07):
    """Pallas implementation of NTXentLoss.forward(z1, z2)."""
    assert z1.shape == z2.shape and z1.ndim == 2
    n, d = z1.shape
    assert n % 8 == 0, "kernel expects the batch size N to be a multiple of 8"
    m = 2 * n

    # ---- wrapper prologue (one fused XLA HBM pass): concat, pad feature dim
    # to a lane-aligned width (zeros change neither norms nor dots), L2
    # normalize (F.normalize semantics, eps=1e-12), bf16 cast, key transpose.
    d_pad = ((d + 127) // 128) * 128
    z = jnp.concatenate([z1, z2], axis=0).astype(jnp.float32)
    if d_pad != d:
        z = jnp.pad(z, ((0, 0), (0, d_pad - d)))
    ss = jnp.sum(z * z, axis=1, keepdims=True)
    zn = z * lax.rsqrt(jnp.maximum(ss, 1e-24))              # == x / max(|x|,1e-12)
    zn_bf16 = zn.astype(jnp.bfloat16)                       # (2N, Dp) rows
    kt_bf16 = zn_bf16.T                                     # (Dp, 2N) keys

    # Largest row tile <= 128 that divides N (keeps partner blocks aligned with
    # query blocks; 128 matches v5e's 128x128 MXUs and keeps the slab small).
    tm = next(t for t in (128, 64, 32, 16, 8) if n % t == 0)
    total_blocks = m // tm
    half_blocks = n // tm
    grid = (total_blocks,)

    # VMEM budget: bf16 keys (x2 buffers) + query/partner tiles (x2 each)
    # + output blocks + f32 (TM, 2N) slab temporaries, with headroom.
    est = (2 * d_pad * m * 2            # resident bf16 keys, double-buffered
           + 4 * tm * d_pad * 2         # query + partner tiles, double-buffered
           + 2 * 8 * tm * 4             # output blocks (sublane-padded)
           + 4 * tm * m * 4)            # slab temporaries
    vmem_limit = int(min(max(2 * est, 32 * 1024 * 1024), 48 * 1024 * 1024))

    kernel = functools.partial(
        _ntxent_kernel, tm=tm, m=m, inv_t=float(1.0 / temperature))

    per_row = pl.pallas_call(
        kernel,
        out_shape=jax.ShapeDtypeStruct((total_blocks, 1, tm), jnp.float32),
        grid_spec=pltpu.PrefetchScalarGridSpec(
            num_scalar_prefetch=0,
            grid=grid,
            in_specs=[
                # per-step query rows
                pl.BlockSpec((tm, d_pad), lambda i: (i, 0)),
                # per-step positive-partner rows: block (i + N/TM) mod (2N/TM)
                pl.BlockSpec((tm, d_pad),
                             lambda i: ((i + half_blocks) % total_blocks, 0)),
                # resident pre-transposed bf16 keys; block index never changes
                # so the DMA is issued only once.
                pl.BlockSpec((d_pad, m), lambda i: (0, 0)),
            ],
            out_specs=pl.BlockSpec((1, 1, tm), lambda i: (i, 0, 0)),
        ),
        compiler_params=pltpu.CompilerParams(
            dimension_semantics=("parallel",),
            vmem_limit_bytes=vmem_limit),
    )(zn_bf16, zn_bf16, kt_bf16)

    return jnp.mean(per_row.reshape(m))


def _reference_loss(z1, z2, temperature=0.07):
    """Pure-JAX f32 reference mirroring the PyTorch module."""
    n, _ = z1.shape
    z = jnp.concatenate([z1, z2], axis=0).astype(jnp.float32)
    z = z / jnp.maximum(jnp.linalg.norm(z, axis=1, keepdims=True), 1e-12)
    sim = (z @ z.T) / temperature
    m = 2 * n
    sim = jnp.where(jnp.eye(m, dtype=bool), -9000000000000000.0, sim)
    idx = jnp.arange(n)
    pos = jnp.concatenate([sim[idx, idx + n], sim[idx + n, idx]])
    denom = jnp.sum(jnp.exp(sim), axis=1)
    return jnp.mean(-jnp.log(jnp.exp(pos) / denom))


if __name__ == "__main__":
    key = jax.random.PRNGKey(0)
    k1, k2 = jax.random.split(key)
    N, D = 8, 32                       # small synthetic projection embeddings
    z1 = jax.random.normal(k1, (N, D), dtype=jnp.float32)
    z2 = jax.random.normal(k2, (N, D), dtype=jnp.float32)

    loss = jax.block_until_ready(ntxent_loss(z1, z2, temperature=0.07))
    ref = jax.block_until_ready(_reference_loss(z1, z2, temperature=0.07))

    # bf16 MXU operands (f32 accumulation) => small similarity rounding error;
    # compare against the f32 reference with a relaxed tolerance.
    assert jnp.allclose(loss, ref, rtol=2e-2, atol=2e-2), (loss, ref)

    print("KERNEL_OK")
</pallas_src>

<mosaic_0001>
module attributes {stable_mosaic.version = 11 : i64} {
  func.func @_ntxent_kernel(%arg0: i32, %arg1: memref<8x128xbf16, #tpu.memory_space<vmem>>, %arg2: memref<8x128xbf16, #tpu.memory_space<vmem>>, %arg3: memref<128x16xbf16, #tpu.memory_space<vmem>>, %arg4: memref<1x1x8xf32, #tpu.memory_space<vmem>>) attributes {dimension_semantics = [#tpu.dimension_semantics<parallel>], iteration_bounds = array<i64: 2>, scalar_prefetch = 0 : i64, scratch_operands = 0 : i64, tpu.core_type = #tpu.core_type<tc>, window_params = [{transform_indices = @transform_0, window_bounds = array<i64: 8, 128>}, {transform_indices = @transform_1, window_bounds = array<i64: 8, 128>}, {pipeline_mode = #tpu.pipeline_mode<synchronous>, transform_indices = @transform_2, window_bounds = array<i64: 128, 16>}, {transform_indices = @transform_3, window_bounds = array<i64: 1, 1, 8>}]} {
    %c0 = arith.constant 0 : index
    %c0_0 = arith.constant 0 : index
    %0 = vector.load %arg1[%c0, %c0_0] : memref<8x128xbf16, #tpu.memory_space<vmem>>, vector<8x128xbf16>
    %c0_1 = arith.constant 0 : index
    %c0_2 = arith.constant 0 : index
    %1 = vector.load %arg3[%c0_1, %c0_2] : memref<128x16xbf16, #tpu.memory_space<vmem>>, vector<128x16xbf16>
    %cst = arith.constant dense<0.000000e+00> : vector<8x16xf32>
    %2 = tpu.matmul %0, %1, %cst {dimension_numbers = #tpu.dot_dimension_numbers<[1], [0], [0], [1], [0, 0, 1, 1], [], []>} : vector<8x128xbf16>, vector<128x16xbf16>, vector<8x16xf32> -> vector<8x16xf32>
    %cst_3 = arith.constant 1.000000e+00 : f32
    %3 = vector.broadcast %cst_3 : f32 to vector<8x16xf32>
    %4 = arith.subf %2, %3 : vector<8x16xf32>
    %cst_4 = arith.constant 14.2857141 : f32
    %5 = vector.broadcast %cst_4 : f32 to vector<8x16xf32>
    %6 = arith.mulf %4, %5 : vector<8x16xf32>
    %c8_i32 = arith.constant 8 : i32
    %7 = arith.muli %arg0, %c8_i32 : i32
    %8 = tpu.iota {dimensions = array<i32: 1>} : vector<8x16xi32>
    %9 = tpu.iota {dimensions = array<i32: 0>} : vector<8x16xi32>
    %10 = vector.broadcast %7 : i32 to vector<8x16xi32>
    %11 = arith.addi %9, %10 : vector<8x16xi32>
    %12 = arith.cmpi eq, %8, %11 : vector<8x16xi32>
    %cst_5 = arith.constant -1.000000e+30 : f32
    %13 = vector.broadcast %cst_5 : f32 to vector<8x16xf32>
    %14 = arith.select %12, %13, %6 : vector<8x16xi1>, vector<8x16xf32>
    %15 = math.exp %14 : vector<8x16xf32>
    %cst_6 = arith.constant dense<0.000000e+00> : vector<8xf32>
    %16 = vector.multi_reduction <add>, %15, %cst_6 [1] : vector<8x16xf32> to vector<8xf32>
    %17 = math.log %16 : vector<8xf32>
    %cst_7 = arith.constant 14.2857141 : f32
    %18 = vector.broadcast %cst_7 : f32 to vector<8xf32>
    %19 = arith.addf %17, %18 : vector<8xf32>
    %20 = arith.extf %0 : vector<8x128xbf16> to vector<8x128xf32>
    %c0_8 = arith.constant 0 : index
    %c0_9 = arith.constant 0 : index
    %21 = vector.load %arg2[%c0_8, %c0_9] : memref<8x128xbf16, #tpu.memory_space<vmem>>, vector<8x128xbf16>
    %22 = arith.extf %21 : vector<8x128xbf16> to vector<8x128xf32>
    %23 = arith.mulf %20, %22 : vector<8x128xf32>
    %cst_10 = arith.constant dense<0.000000e+00> : vector<8xf32>
    %24 = vector.multi_reduction <add>, %23, %cst_10 [1] : vector<8x128xf32> to vector<8xf32>
    %cst_11 = arith.constant 14.2857141 : f32
    %25 = vector.broadcast %cst_11 : f32 to vector<8xf32>
    %26 = arith.mulf %25, %24 : vector<8xf32>
    %27 = arith.subf %19, %26 : vector<8xf32>
    %c0_12 = arith.constant 0 : index
    %c0_13 = arith.constant 0 : index
    %c0_14 = arith.constant 0 : index
    %28 = vector.load %arg4[%c0_12, %c0_13, %c0_14] : memref<1x1x8xf32, #tpu.memory_space<vmem>>, vector<1x1x8xf32>
    %29 = vector.shape_cast %28 : vector<1x1x8xf32> to vector<8xf32>
    %30 = vector.shape_cast %27 : vector<8xf32> to vector<1x1x8xf32>
    tpu.vector_store %arg4[%c0_12, %c0_13, %c0_14], %30 {strides = array<i32>} : memref<1x1x8xf32, #tpu.memory_space<vmem>>, vector<1x1x8xf32>,
    return
  }
  func.func @transform_0(%arg0: i32) -> (i32, i32) {
    %c0_i32 = arith.constant 0 : i32
    %c0_i32_0 = arith.constant 0 : i32
    return %arg0, %c0_i32 : i32, i32
  }
  func.func @transform_1(%arg0: i32) -> (i32, i32) {
    %c1_i32 = arith.constant 1 : i32
    %0 = arith.addi %arg0, %c1_i32 : i32
    %c2_i32 = arith.constant 2 : i32
    %c0_i32 = arith.constant 0 : i32
    %1 = arith.cmpi eq, %c2_i32, %c0_i32 : i32
    %c1_i32_0 = arith.constant 1 : i32
    %2 = arith.select %1, %c1_i32_0, %c2_i32 : i32
    %3 = arith.remsi %0, %2 : i32
    %c0_i32_1 = arith.constant 0 : i32
    %4 = arith.cmpi ne, %3, %c0_i32_1 : i32
    %c0_i32_2 = arith.constant 0 : i32
    %5 = arith.cmpi slt, %3, %c0_i32_2 : i32
    %c0_i32_3 = arith.constant 0 : i32
    %6 = arith.cmpi slt, %2, %c0_i32_3 : i32
    %7 = arith.xori %5, %6 : i1
    %8 = arith.andi %7, %4 : i1
    %9 = arith.addi %3, %2 : i32
    %10 = arith.select %8, %9, %3 : i32
    %c0_i32_4 = arith.constant 0 : i32
    %c0_i32_5 = arith.constant 0 : i32
    return %10, %c0_i32_4 : i32, i32
  }
  func.func @transform_2(%arg0: i32) -> (i32, i32) {
    %c0_i32 = arith.constant 0 : i32
    %c0_i32_0 = arith.constant 0 : i32
    %c0_i32_1 = arith.constant 0 : i32
    return %c0_i32, %c0_i32_0 : i32, i32
  }
  func.func @transform_3(%arg0: i32) -> (i32, i32, i32) {
    %c0_i32 = arith.constant 0 : i32
    %c0_i32_0 = arith.constant 0 : i32
    %c0_i32_1 = arith.constant 0 : i32
    return %arg0, %c0_i32, %c0_i32_0 : i32, i32, i32
  }
}

</mosaic_0001>

<bundles_post_ra>
// kernel: tpu_custom_call.1
= control target key start
LH: loop header
LB: loop body
LE: loop exit
PB: predicated region body
PF: predicated region fallthrough
CT: control target
= control target key end

     0   :  { %8 = vsyncpa [#allocation3], 0  ;;  %s821_s0 = inlined_call_operand.vmem [shape: bf16[16,128], index: 0, kind: input, shape index: {}]   ;;  %s822_s1 = inlined_call_operand.vmem [shape: bf16[16,128], index: 1, kind: input, shape index: {}]   ;;  %s823_s2 = inlined_call_operand.vmem [shape: bf16[128,16], index: 2, kind: input, shape index: {}]   ;;  %s824_s3 = inlined_call_operand.hbm [shape: f32[2,1,8], index: 3, kind: output, shape index: {}]  }
   0x1   :  { %10 = vsyncpa [#allocation3 + $0x1], 0  ;;  %s692_s12 = smov 0   ;;  %s694_s13 = smov 0  }
   0x2   :  { %s696_s14 = smov 0   ;;  %s698_s15 = smov 0  }
   0x3 LB: > { %s713_s16 = sadd.s32 4294967295, %s667_s15   ;;  %s495_s17 = sadd.s32 4294967294, %s667_s15   ;;  %s667_s15 = sphi %s698_s15, %s830_s15   ;;  %s663_s14 = sphi %s696_s14, %s829_s14   ;;  %s659_s13 = sphi %s694_s13, %s828_s13   ;;  %s655_s12 = sphi %s692_s12, %s827_s12  }
   0x4   : > { %s717_s18 = sadd.s32 1, %s667_s15   ;;  %s122_s19 = sadd.s32 1, %s663_s14 }
   0x5   : > { %s119_s20 = ssub.s32 %s667_s15, %s717_s18  ;;  %p132_p0 = scmp.ne.s32.totalorder %s663_s14, %s659_s13 }
   0x6   : > { %p120_p1 = scmp.eq.s32.totalorder %s119_s20, 0  ;;  %p133_p2 = scmp.eq.s32.totalorder %s713_s16, 1 }
   0x7   : > { %p138_p3 = scmp.ne.s32.totalorder %s659_s13, %s655_s12  ;;  %p139_p4 = scmp.eq.s32.totalorder %s495_s17, 1 }
   0x8   : > { %s728_s21 = scalar_select %p120_p1, %s663_s14, %s122_s19  }
   0x9   : > { %p730_p5 = por %p133_p2, %p132_p0  ;;  %p734_p6 = por %p139_p4, %p138_p3 }
   0xa   : > { %p504_p7 = scmp.ge.s32.totalorder %s667_s15, 1  ;;  %p200_p8 = scmp.lt.s32.totalorder %s667_s15, 3 }
   0xc   : > { %p201_p9 = pnand %p504_p7, %p200_p8 }
   0xd   : > { %v593_v0 = vld [vmem:[%s823_s2] sm:$0xff] (!%p201_p9)   ;;  %v669_v1 = vmov (!%p201_p9), 0.0   ;;  %v594_v2 = vld [vmem:[%s823_s2 + $0x8] sm:$0xff] (!%p201_p9)   ;;  %vm670_vm0 = vmmov (!%p201_p9), 0   ;;  %v595_v3 = vld [vmem:[%s823_s2 + $0x10] sm:$0xff] (!%p201_p9)   ;;  %p239_p10 = scmp.lt.s32.totalorder (!%p201_p9), %s713_s16, 1  ;;  %v382_v10 = vlaneseq (!%p201_p9) }
   0xe   : > { %204 = sbr.rel (%p201_p9) target bundleno = 452 (0x1c4), region = 32  ;;  %532 = vmatprep.subr.bf16.mxu0 (!%p201_p9), %v669_v1  ;;  %548 = vmatprep.mubr.msk.bf16.mxu0 (!%p201_p9), %vm670_vm0, %v669_v1  ;;  %v596_v4 = vld [vmem:[%s823_s2 + $0x18] sm:$0xff] (!%p201_p9)   ;;  %v597_v5 = vld [vmem:[%s823_s2 + $0x20] sm:$0xff] (!%p201_p9)   ;;  %v598_v6 = vld [vmem:[%s823_s2 + $0x28] sm:$0xff] (!%p201_p9)   ;;  %s243_s27 = sadd.s32 (!%p201_p9), 1, %s713_s16  ;;  %vm392_vm2 = vcmask (!%p201_p9), 130048  }
   0xf   : > { %533 = vmatpush3.bf16.msra.mxu0 (!%p201_p9), %v593_v0  ;;  %v599_v7 = vld [vmem:[%s823_s2 + $0x30] sm:$0xff] (!%p201_p9)   ;;  %v600_v8 = vld [vmem:[%s823_s2 + $0x38] sm:$0xff] (!%p201_p9)   ;;  %s245_s28 = ssub.s32 (!%p201_p9), 0, %s243_s27  ;;  %p244_p11 = scmp.lt.s32.totalorder (!%p201_p9), %s243_s27, 0  ;;  %v385_v11 = vshrl.u32 (!%p201_p9), %v382_v10, 7  ;;  %v383_v13 = vand.u32 (!%p201_p9), 127, %v382_v10 }
  0x10   : > { %534 = vmatprep.subr.bf16.mxu0 (!%p201_p9), %v669_v1  ;;  %s506_s29 = smin.u32 (!%p201_p9), %s245_s28, %s243_s27  ;;  %s519_s5 = sshll.u32 (!%p201_p9), %s713_s16, 3  ;;  %vm413_vm3 = vcmask (!%p201_p9), 57344  }
  0x11   : > { %s247_s30 = sand.u32 (!%p201_p9), 1, %s506_s29   ;;  %v386_v12 = vstv (!%p201_p9), %s519_s5  ;;  %s237_s11 = sand.u32 (!%p201_p9), 1, %s659_s13   ;;  %v410_v35 = vsub.s32 (!%p201_p9), %v383_v13, %v385_v11 }
  0x12   : > { %s248_s4 = ssub.s32 (!%p201_p9), 0, %s247_s30  ;;  %v387_v14 = vadd.s32 (!%p201_p9), %v386_v12, %v385_v11  ;;  %s238_s19 = scalar_lea.vmem (!%p201_p9), [#allocation2], %s237_s11 }
  0x13   : > { %535 = vmatpush3.bf16.msra.mxu0 (!%p201_p9), %v594_v2  ;;  %s428_s20 = sshll.u32 (!%p201_p9), %s238_s19, 4  ;;  %s416_s27 = scalar_lea.sflag (!%p201_p9), [#allocation3], %s237_s11  ;;  %s781_s20 = int_to_ptr.vmem [resolvable:$true] %s428_s20 }
  0x14   : > { %536 = vmatprep.subr.bf16.mxu0 (!%p201_p9), %v669_v1  ;;  %vm388_vm1 = vcmp.eq.s32.totalorder (!%p201_p9), %v383_v13, %v387_v14  ;;  %s605_s28 = scalar_lea.vmem (!%p201_p9), %s781_s20, 16 }
  0x15   : > { %s240_s9 = scalar_select %p239_p10, %s713_s16, 1 }
  0x16   : > { %s832_s4 = smov (!%p244_p11, %s248_s4), %s247_s30  ;;  %p606_p0 = scmp.ne.s32.totalorder %s781_s20, %s605_s28 }
  0x17   : > { %537 = vmatpush3.bf16.msra.mxu0 %v595_v3  ;;  %s505_s17 = sshll.u32 %s240_s9, 2  ;;  %p508_p12 = scmp.lt.s32.totalorder %s832_s4, 0 }
  0x18   : > { %538 = vmatprep.subr.bf16.mxu0 %v669_v1  ;;  %s242_s26 = scalar_lea.vmem %s821_s0, %s505_s17  ;;  %s254_s6 = sadd.s32 2, %s832_s4 }
  0x19   : > { %v274_v9 = vld [vmem:[%s242_s26] sm:$0xf]  ;;  %s834_s6 = smov (!%p508_p12, %s254_s6), %s832_s4  ;;  %s520_s17 = sshll.u32 %s713_s16, 4 }
  0x1a   : > { %p256_p13 = scmp.lt.s32.totalorder %s834_s6, 1  ;;  %v399_v24 = vunpack.c.l.bf16 %v274_v9  ;;  %s779_s26 = scalar_lea.hbm %s824_s3, %s520_s17 }
  0x1b   : > { %539 = vmatpush3.bf16.msra.mxu0 %v596_v4  ;;  %p607_p1 = pnand %p606_p0, %p730_p5  ;;  %s671_s16 = smov [#allocation2]  }
  0x1c   : > { %540 = vmatprep.subr.bf16.mxu0 %v669_v1  ;;  %s836_s6 = smov (!%p256_p13, %s834_s6), 1  ;;  %s609_s29 = sshll.u32 %s671_s16, 4  ;;  %s610_s29 = int_to_ptr.vmem [resolvable:$false] %s609_s29 }
  0x1d   : > { %s509_s7 = sshll.u32 %s836_s6, 2  ;;  %p608_p2 = pneg %p607_p1 }
  0x1e   : > { %s259_s10 = scalar_lea.vmem %s822_s1, %s509_s7  ;;  %s611_s30 = scalar_lea.vmem %s610_s29, 32 }
  0x1f   : > { %541 = vmatpush3.bf16.msra.mxu0 %v597_v5  ;;  %v400_v23 = vld [vmem:[%s259_s10] sm:$0xf]  ;;  %p612_p3 = scmp.lt.s32.totalorder %s781_s20, %s610_s29  ;;  %p613_p4 = scmp.lt.s32.totalorder %s611_s30, %s605_s28 }
  0x20   : > { %542 = vmatprep.subr.bf16.mxu0 %v669_v1  ;;  %v401_v25 = vunpack.c.l.bf16 %v400_v23 }
  0x21   : > { %p614_p7 = por %p613_p4, %p612_p3 }
  0x22   : > { %v402_v28 = vmul.f32 %v401_v25, %v399_v24 }
  0x23   : > { %543 = vmatpush3.bf16.msra.mxu0 %v598_v6  ;;  %p615_p8 = pnand %p614_p7, %p608_p2 }
  0x24   : > { %544 = vmatprep.subr.bf16.mxu0 %v669_v1 }
  0x27   : > { %545 = vmatpush3.bf16.msra.mxu0 %v599_v7 }
  0x28   : > { %546 = vmatprep.subr.bf16.mxu0 %v669_v1 }
  0x2b   : > { %547 = vmatpush3.bf16.msra.mxu0 %v600_v8 }
  0x2e   : > { %549 = vmatmul.mubr.bf16.vlgmr.msra.gmra.mrb[0].mxu0 %v274_v9 }
 0x101   : > { %v373_v15 = vpop.f32.mrb[0].mxu0 }
 0x102   : > { %v518_v16 = vadd.f32 -1.0, %v373_v15  ;;  %v550_v17 = vpop.f32.mrb[1].mxu0 }
 0x103   : > { %v376_v18 = vpop.f32.mrb[2].mxu0 }
 0x104   : > { %v380_v19 = vmul.f32 14.285714, %v518_v16  ;;  %v551_v20 = vpop.f32.mrb[3].mxu0 }
 0x106   : > { %v389_v21 = vsel %vm388_vm1, -1e+30, %v380_v19 }
 0x107   : > { %v390_v22 = vmul.f32 1.442695, %v389_v21 }
 0x109   : > { %601 = vpow2.f32 %v390_v22 }
 0x113   : > { %v602_v26 = vpop.eup %601 }
 0x114   : > { %v393_v27 = vsel %vm392_vm2, %v602_v26, 0.0 }
 0x115   : > { %394 = vadd.xlane.f32.xlu0 %v393_v27 }
 0x119   : > { %403 = vadd.xlane.f32.xlu0 %v402_v28 }
 0x1a2   : > { %v395_v29 = vpop.xlane.xlu0 %394 }
 0x1a3   : > { %603 = vlog2.f32 %v395_v29 }
 0x1a6   : > { %v404_v30 = vpop.xlane.xlu0 %403 }
 0x1a7   : > { %v405_v33 = vmul.f32 14.285714, %v404_v30 }
 0x1ad   : > { %v604_v31 = vpop.eup %603 }
 0x1ae   : > { %v397_v32 = vmul.f32 0.6931472, %v604_v31 }
 0x1b0   : > { %v398_v34 = vadd.f32 14.285714, %v397_v32 }
 0x1b2   : > { %v406_v36 = vsub.f32 %v398_v34, %v405_v33 }
 0x1b4   : > { %v411_v37 = vrot.slane %v406_v36, %v410_v35 }
 0x1b6   : > { %414 = vst.msk [vmem:[%s238_s19] sm:$0x1] %vm413_vm3, %v411_v37 }
 0x1b7   : > { %618 = shalt.err (!%p615_p8)
}
 0x1b8   : > { %s619_s4 = scalar_lea.hbm %s779_s26, 16  ;;  %s623_s7 = scalar_lea.hbm %s824_s3, 32 }
 0x1b9   : > { %p620_p9 = scmp.ne.s32.totalorder %s779_s26, %s619_s4  ;;  %p624_p12 = scmp.lt.u32.totalorder %s779_s26, %s824_s3 }
 0x1ba   : > { %p625_p13 = scmp.lt.u32.totalorder %s623_s7, %s619_s4  ;;  %p627_p1 = scmp.lt.u32.totalorder %s619_s4, %s779_s26 }
 0x1bb   : > { %p621_p10 = pnand %p620_p9, %p730_p5 }
 0x1bc   : > { %p626_p0 = por %p625_p13, %p624_p12 }
 0x1bd   : > { %p622_p11 = pneg %p621_p10 }
 0x1be   : > { %p628_p2 = por %p627_p1, %p626_p0 }
 0x1c0   : > { %p629_p3 = pnand %p628_p2, %p622_p11 }
 0x1c2   : > { %632 = shalt.err (!%p629_p3)
}
 0x1c3   : > { %552 = dma.vmem_to_hbm [thread:$0]  (%p730_p5), %s781_s20, 16, %s779_s26, %s416_s27  }
 0x1c4 PF: > { %p558_p4 = scmp.ge.s32.totalorder %s667_s15, 2  ;;  %s440_s10 = sand.u32 1, %s655_s12  }
 0x1c5   : > { %s441_s11 = scalar_lea.sflag [#allocation3], %s440_s10 }
 0x1c6   : > { %p555_p7 = pnand %p558_p4, %p734_p6 }
 0x1c8   : > { %650 = dma.done.wait (!%p555_p7), %s441_s11, 16  }
 0x1c9   : > { %652 = vsyncadd (!%p555_p7), %s441_s11, 4294967280  ;;  %p13_p8 = scmp.ge.s32.totalorder %s717_s18, 4   ;;  %s827_s12 = smov %s659_s13 }
 0x1ca   : > { %s828_s13 = smov %s663_s14  ;;  %s829_s14 = smov %s728_s21 }
 0x1cb   : > { %s830_s15 = smov %s717_s18  ;;  %15 = sbr.rel (!%p13_p8) target bundleno = 3 (0x3), region = 70 }
 0x1d2   :  { %445 = vsyncpa [#allocation3], 1 }
 0x1d3   :  { %447 = vsyncpa [#allocation3 + $0x1], 1 }

</bundles_post_ra>
